<compile_context>
chip_gen: v6e
topology: v6e:2x2x1
jax: 0.10.0
libtpu: 0.0.40
codegen_flags: <defaults>
</compile_context>

<pallas_src>
import functools

import jax
import jax.numpy as jnp
from jax.experimental import pallas as pl
from jax.experimental.pallas import tpu as pltpu


def _bce_kernel(x_ref, t_ref, o_ref, acc_ref, *, bn, ts, n_valid, s_valid,
                binary_targets, lane_dense_acc, needs_batch_mask,
                needs_row_mask):
    bi = pl.program_id(0)
    si = pl.program_id(1)

    @pl.when(si == 0)
    def _init():
        acc_ref[...] = jnp.zeros_like(acc_ref)

    x = x_ref[...].astype(jnp.float32)          # (bn, ts, 128)
    t = t_ref[...].astype(jnp.float32)          # native-dtype targets, cast here

    p = jax.nn.sigmoid(x)
    if binary_targets:
        # t in {0,1}: single clamped log, bit-identical to the general formula.
        pt = jnp.where(t >= 0.5, p, 1.0 - p)
        loss = -jnp.maximum(jnp.log(pt), -100.0)
    else:
        # PyTorch BCELoss clamps both log terms at -100.
        log_p = jnp.maximum(jnp.log(p), -100.0)
        log_1mp = jnp.maximum(jnp.log(1.0 - p), -100.0)
        loss = -(t * log_p + (1.0 - t) * log_1mp)

    if needs_row_mask:
        # Last spatial block may extend past the real row count; OOB rows hold
        # undefined data -> zero them before accumulating.
        row = si * ts + jax.lax.broadcasted_iota(jnp.int32, (ts, 128), 0)
        loss = jnp.where((row < s_valid)[None, :, :], loss, 0.0)
    if needs_batch_mask:
        # Last batch block may extend past the real batch count.
        b = bi * bn + jax.lax.broadcasted_iota(jnp.int32, (bn, 128), 0)
        loss = jnp.where((b < n_valid)[:, None, :], loss, 0.0)

    if lane_dense_acc:
        # (bn, ts, 128) -> (bn*ts//8, 8, 128); leading-axis sum = pure VPU adds.
        acc_ref[...] += loss.reshape(-1, 8, 128).sum(axis=0)
    else:
        acc_ref[0:1, :] += loss.sum(axis=0).sum(axis=0, keepdims=True)

    @pl.when(si == pl.num_programs(1) - 1)
    def _finalize():
        o_ref[...] = acc_ref[...]


def _sublane_multiple(dtype):
    return max(8, 32 // jnp.dtype(dtype).itemsize)


def bce_loss_pallas(inputs, targets, *, rows_per_step=2048):
    """inputs: (N, C, H, W) float; targets: (N, H, W) bool / int / float.

    Returns scalar mean BCE of sigmoid(inputs[:, 1]) vs targets.float(),
    matching torch.nn.BCELoss()(sigmoid(inputs[:, 1]), targets.float()).
    """
    n, c, h, w = inputs.shape
    assert c >= 2, "channel index 1 must exist"
    assert targets.shape == (n, h, w)

    if targets.dtype == jnp.bool_:
        targets = targets.astype(jnp.int8)        # 1 byte/elem, Pallas-friendly
    binary_targets = bool(jnp.issubdtype(targets.dtype, jnp.integer))

    L = h * w
    total_count = n * L

    if L % 128 == 0:
        # Free (metadata-only) reshapes: lane-dense view; channel selection is
        # done by the BlockSpec index_map, no wrapper-side HBM copies.
        x4 = inputs.reshape(n, c, L // 128, 128)
        t3 = targets.reshape(n, L // 128, 128)
        chan = 1
    else:
        # TODO(synk): handle the H*W % 128 != 0 ragged tail fully in-kernel;
        # this fallback pads one native-dtype copy of the channel-1 plane and
        # targets so padded elements contribute exactly 0 to the loss sum.
        pad = (-L) % 128
        xs = jnp.pad(inputs[:, 1, :, :].reshape(n, L), ((0, 0), (0, pad)),
                     constant_values=30.0)        # sigmoid -> exactly 1.0 in f32
        tp = jnp.pad(targets.reshape(n, L), ((0, 0), (0, pad)),
                     constant_values=1)
        lp = L + pad
        x4 = xs.reshape(n, 1, lp // 128, 128)
        t3 = tp.reshape(n, lp // 128, 128)
        chan = 0

    s = x4.shape[2]                               # rows of 128 lanes per image

    # Row budget per grid step (~rows * 128 lanes * 4 B of f32 logits ~= 1 MiB
    # at the default), rounded to the strictest packed-dtype sublane multiple.
    sub = max(_sublane_multiple(x4.dtype), _sublane_multiple(t3.dtype))
    rows = max(sub, (rows_per_step // sub) * sub)
    if s <= rows:
        ts = s                                    # full plane per image (full dim)
        bn = min(n, max(1, rows // max(s, 1)))    # batch-block to fill the slab
    else:
        ts = rows
        bn = 1
    num_b = pl.cdiv(n, bn)
    num_s = pl.cdiv(s, ts)
    needs_batch_mask = (num_b * bn != n)
    needs_row_mask = (num_s * ts != s)
    lane_dense_acc = (ts % 8 == 0)

    kernel = functools.partial(
        _bce_kernel, bn=bn, ts=ts, n_valid=n, s_valid=s,
        binary_targets=binary_targets, lane_dense_acc=lane_dense_acc,
        needs_batch_mask=needs_batch_mask, needs_row_mask=needs_row_mask)

    partials = pl.pallas_call(
        kernel,
        out_shape=jax.ShapeDtypeStruct((num_b, 8, 128), jnp.float32),
        grid_spec=pltpu.PrefetchScalarGridSpec(
            num_scalar_prefetch=0,
            grid=(num_b, num_s),
            in_specs=[
                # logits: batch block bi, channel `chan`, spatial block si
                pl.BlockSpec((bn, None, ts, 128),
                             lambda bi, si: (bi, chan, si, 0)),
                # targets stream in their native dtype
                pl.BlockSpec((bn, ts, 128), lambda bi, si: (bi, si, 0)),
            ],
            # one lane-dense (8,128) partial-sum slab per batch block
            out_specs=pl.BlockSpec((None, 8, 128), lambda bi, si: (bi, 0, 0)),
            scratch_shapes=[pltpu.VMEM((8, 128), jnp.float32)],
        ),
        compiler_params=pltpu.CompilerParams(
            # Batch blocks are independent (own output slab, per-block acc
            # init/finalize) -> megacore may split them; spatial axis reduces.
            dimension_semantics=("parallel", "arbitrary"),
            vmem_limit_bytes=32 * 1024 * 1024,
        ),
    )(x4, t3)

    return jnp.sum(partials) / jnp.float32(total_count)


def bce_loss_ref(inputs, targets):
    p = jax.nn.sigmoid(inputs[:, 1, :, :].astype(jnp.float32))
    t = targets.astype(jnp.float32)
    log_p = jnp.maximum(jnp.log(p), -100.0)
    log_1mp = jnp.maximum(jnp.log(1.0 - p), -100.0)
    return jnp.mean(-(t * log_p + (1.0 - t) * log_1mp))


if __name__ == "__main__":
    key = jax.random.PRNGKey(0)
    keys = jax.random.split(key, 6)

    # Test 1: module-shaped small case — int8 binary targets, one fused block.
    x1 = jax.random.normal(keys[0], (2, 4, 16, 16), dtype=jnp.float32)
    t1 = (jax.random.uniform(keys[1], (2, 16, 16)) > 0.5).astype(jnp.int8)
    o1 = bce_loss_pallas(x1, t1)
    jax.block_until_ready(o1)
    r1 = bce_loss_ref(x1, t1)
    assert jnp.allclose(o1, r1, atol=1e-5, rtol=1e-5), (o1, r1)

    # Test 2: float targets (general formula), ragged last batch block (mask).
    x2 = jax.random.normal(keys[2], (3, 2, 16, 64), dtype=jnp.float32)
    t2 = jax.random.uniform(keys[3], (3, 16, 64), dtype=jnp.float32)
    o2 = bce_loss_pallas(x2, t2, rows_per_step=16)
    jax.block_until_ready(o2)
    r2 = bce_loss_ref(x2, t2)
    assert jnp.allclose(o2, r2, atol=1e-5, rtol=1e-5), (o2, r2)

    # Test 3: spatial tiling with a ragged last spatial block (row mask), int8.
    x3 = jax.random.normal(keys[4], (2, 3, 96, 64), dtype=jnp.float32)
    t3 = (jax.random.uniform(keys[5], (2, 96, 64)) > 0.5).astype(jnp.int8)
    o3 = bce_loss_pallas(x3, t3, rows_per_step=16)
    jax.block_until_ready(o3)
    r3 = bce_loss_ref(x3, t3)
    assert jnp.allclose(o3, r3, atol=1e-5, rtol=1e-5), (o3, r3)

    print("KERNEL_OK")
</pallas_src>

<mosaic_0001>
module attributes {stable_mosaic.version = 11 : i64} {
  func.func @_bce_kernel(%arg0: i32, %arg1: i32, %arg2: memref<2x1x2x128xf32, #tpu.memory_space<vmem>>, %arg3: memref<2x2x128xi8, #tpu.memory_space<vmem>>, %arg4: memref<1x8x128xf32, #tpu.memory_space<vmem>>, %arg5: memref<8x128xf32, #tpu.memory_space<vmem>>) attributes {dimension_semantics = [#tpu.dimension_semantics<parallel>, #tpu.dimension_semantics<arbitrary>], iteration_bounds = array<i64: 1, 1>, scalar_prefetch = 0 : i64, scratch_operands = 1 : i64, tpu.core_type = #tpu.core_type<tc>, window_params = [{transform_indices = @transform_0, window_bounds = array<i64: 2, 1, 2, 128>}, {transform_indices = @transform_1, window_bounds = array<i64: 2, 2, 128>}, {transform_indices = @transform_2, window_bounds = array<i64: 1, 8, 128>}]} {
    %c0_i32 = arith.constant 0 : i32
    %0 = arith.cmpi eq, %arg1, %c0_i32 : i32
    %1 = arith.extui %0 : i1 to i32
    %c0_i32_0 = arith.constant 0 : i32
    %2 = arith.cmpi ne, %1, %c0_i32_0 : i32
    scf.if %2 {
      %cst_19 = arith.constant 0.000000e+00 : f32
      %31 = vector.broadcast %cst_19 : f32 to vector<8x128xf32>
      %c0_20 = arith.constant 0 : index
      %c0_21 = arith.constant 0 : index
      %32 = vector.load %arg5[%c0_20, %c0_21] : memref<8x128xf32, #tpu.memory_space<vmem>>, vector<8x128xf32>
      tpu.vector_store %arg5[%c0_20, %c0_21], %31 {strides = array<i32>} : memref<8x128xf32, #tpu.memory_space<vmem>>, vector<8x128xf32>,
    } else {
    }
    %c0 = arith.constant 0 : index
    %c0_1 = arith.constant 0 : index
    %c0_2 = arith.constant 0 : index
    %c0_3 = arith.constant 0 : index
    %3 = vector.load %arg2[%c0, %c0_1, %c0_2, %c0_3] : memref<2x1x2x128xf32, #tpu.memory_space<vmem>>, vector<2x1x2x128xf32>
    %4 = vector.shape_cast %3 : vector<2x1x2x128xf32> to vector<2x2x128xf32>
    %c0_4 = arith.constant 0 : index
    %c0_5 = arith.constant 0 : index
    %c0_6 = arith.constant 0 : index
    %5 = vector.load %arg3[%c0_4, %c0_5, %c0_6] : memref<2x2x128xi8, #tpu.memory_space<vmem>>, vector<2x2x128xi8>
    %6 = arith.sitofp %5 : vector<2x2x128xi8> to vector<2x2x128xf32>
    %7 = arith.negf %4 : vector<2x2x128xf32>
    %8 = math.exp %7 : vector<2x2x128xf32>
    %cst = arith.constant 1.000000e+00 : f32
    %9 = vector.broadcast %cst : f32 to vector<2x2x128xf32>
    %10 = arith.addf %9, %8 : vector<2x2x128xf32>
    %11 = arith.divf %9, %10 : vector<2x2x128xf32>
    %cst_7 = arith.constant 5.000000e-01 : f32
    %12 = vector.broadcast %cst_7 : f32 to vector<2x2x128xf32>
    %13 = arith.cmpf oge, %6, %12 : vector<2x2x128xf32>
    %cst_8 = arith.constant 1.000000e+00 : f32
    %14 = vector.broadcast %cst_8 : f32 to vector<2x2x128xf32>
    %15 = arith.subf %14, %11 : vector<2x2x128xf32>
    %16 = arith.select %13, %11, %15 : vector<2x2x128xi1>, vector<2x2x128xf32>
    %17 = math.log %16 : vector<2x2x128xf32>
    %cst_9 = arith.constant -1.000000e+02 : f32
    %18 = vector.broadcast %cst_9 : f32 to vector<2x2x128xf32>
    %19 = arith.maximumf %17, %18 : vector<2x2x128xf32>
    %cst_10 = arith.constant 0.000000e+00 : f32
    %20 = vector.broadcast %cst_10 : f32 to vector<2x2x128xf32>
    %21 = arith.subf %20, %19 : vector<2x2x128xf32>
    %c0_11 = arith.constant 0 : index
    %c0_12 = arith.constant 0 : index
    %22 = vector.load %arg5[%c0_11, %c0_12] : memref<8x128xf32, #tpu.memory_space<vmem>>, vector<1x128xf32>
    %cst_13 = arith.constant dense<0.000000e+00> : vector<2x128xf32>
    %23 = vector.multi_reduction <add>, %21, %cst_13 [0] : vector<2x2x128xf32> to vector<2x128xf32>
    %cst_14 = arith.constant dense<0.000000e+00> : vector<128xf32>
    %24 = vector.multi_reduction <add>, %23, %cst_14 [0] : vector<2x128xf32> to vector<128xf32>
    %25 = vector.shape_cast %24 : vector<128xf32> to vector<1x128xf32>
    %26 = arith.addf %22, %25 : vector<1x128xf32>
    %c0_15 = arith.constant 0 : index
    %c0_16 = arith.constant 0 : index
    %27 = vector.load %arg5[%c0_15, %c0_16] : memref<8x128xf32, #tpu.memory_space<vmem>>, vector<1x128xf32>
    tpu.vector_store %arg5[%c0_15, %c0_16], %26 {strides = array<i32>} : memref<8x128xf32, #tpu.memory_space<vmem>>, vector<1x128xf32>,
    %c0_i32_17 = arith.constant 0 : i32
    %28 = arith.cmpi eq, %arg1, %c0_i32_17 : i32
    %29 = arith.extui %28 : i1 to i32
    %c0_i32_18 = arith.constant 0 : i32
    %30 = arith.cmpi ne, %29, %c0_i32_18 : i32
    scf.if %30 {
      %c0_19 = arith.constant 0 : index
      %c0_20 = arith.constant 0 : index
      %31 = vector.load %arg5[%c0_19, %c0_20] : memref<8x128xf32, #tpu.memory_space<vmem>>, vector<8x128xf32>
      %c0_21 = arith.constant 0 : index
      %c0_22 = arith.constant 0 : index
      %c0_23 = arith.constant 0 : index
      %32 = vector.load %arg4[%c0_21, %c0_22, %c0_23] : memref<1x8x128xf32, #tpu.memory_space<vmem>>, vector<1x8x128xf32>
      %33 = vector.shape_cast %32 : vector<1x8x128xf32> to vector<8x128xf32>
      %34 = vector.shape_cast %31 : vector<8x128xf32> to vector<1x8x128xf32>
      tpu.vector_store %arg4[%c0_21, %c0_22, %c0_23], %34 {strides = array<i32>} : memref<1x8x128xf32, #tpu.memory_space<vmem>>, vector<1x8x128xf32>,
    } else {
    }
    return
  }
  func.func @transform_0(%arg0: i32, %arg1: i32) -> (i32, i32, i32, i32) {
    %c1_i32 = arith.constant 1 : i32
    %c0_i32 = arith.constant 0 : i32
    %c0_i32_0 = arith.constant 0 : i32
    return %arg0, %c1_i32, %arg1, %c0_i32 : i32, i32, i32, i32
  }
  func.func @transform_1(%arg0: i32, %arg1: i32) -> (i32, i32, i32) {
    %c0_i32 = arith.constant 0 : i32
    %c0_i32_0 = arith.constant 0 : i32
    return %arg0, %arg1, %c0_i32 : i32, i32, i32
  }
  func.func @transform_2(%arg0: i32, %arg1: i32) -> (i32, i32, i32) {
    %c0_i32 = arith.constant 0 : i32
    %c0_i32_0 = arith.constant 0 : i32
    %c0_i32_1 = arith.constant 0 : i32
    return %arg0, %c0_i32, %c0_i32_0 : i32, i32, i32
  }
}

</mosaic_0001>

<bundles_post_ra>
// kernel: tpu_custom_call.1
= control target key start
LH: loop header
LB: loop body
LE: loop exit
PB: predicated region body
PF: predicated region fallthrough
CT: control target
= control target key end

     0   :  { %7 = vsyncpa [#allocation4], 0  ;;  %s240_s0 = inlined_call_operand.hbm [shape: f32[2,4,2,128], index: 0, kind: input, shape index: {}]   ;;  %s241_s1 = inlined_call_operand.hbm [shape: s8[2,2,128], index: 1, kind: input, shape index: {}]   ;;  %s242_s2 = inlined_call_operand.hbm [shape: f32[1,8,128], index: 2, kind: output, shape index: {}]  }
   0x1   :  { %8 = vsyncpa [#allocation7], 0 }
   0x2   :  { %9 = vsyncpa [#allocation5], 0  ;;  %s15_s11 = scalar_lea.hbm %s240_s0, 32  ;;  %s207_s12 = smov [#allocation3]  }
   0x3   :  { %s16_s13 = sshll.u32 %s207_s12, 4  ;;  %s17_s13 = int_to_ptr.vmem [resolvable:$true] %s16_s13 }
   0x4   :  { %s148_s14 = scalar_lea.vmem %s17_s13, 64  ;;  %p153_p1 = scmp.lt.s32.totalorder %s17_s13, %s17_s13 }
   0x5   :  { %p149_p0 = scmp.ne.s32.totalorder %s17_s13, %s148_s14  ;;  %p154_p2 = scmp.lt.s32.totalorder %s148_s14, %s148_s14 }
   0x7   :  { %p155_p3 = por %p154_p2, %p153_p1 }
   0x9   :  { %p156_p4 = pnand %p155_p3, %p149_p0 }
   0xb   :  { %159 = shalt.err (!%p156_p4)
}
   0xc   :  { %s208_s15 = smov 128   ;;  %s209_s16 = smov 32  }
   0xd   :  { %s210_s17 = smov 2   ;;  %s211_s18 = smov [#allocation6]  }
   0xe   :  { %22 = dma.hbm_to_vmem [thread:$0]  %s15_s11, 64, %s17_s13, [#allocation4], %s208_s15, %s209_s16, %s210_s17  }
   0xf   :  { %s28_s19 = sshll.u32 %s211_s18, 4  ;;  %s29_s19 = int_to_ptr.vmem [resolvable:$true] %s28_s19 }
  0x10   :  { %s169_s20 = scalar_lea.vmem %s29_s19, 32  ;;  %p174_p6 = scmp.lt.s32.totalorder %s29_s19, %s29_s19 }
  0x11   :  { %p170_p5 = scmp.ne.s32.totalorder %s29_s19, %s169_s20  ;;  %p175_p7 = scmp.lt.s32.totalorder %s169_s20, %s169_s20 }
  0x13   :  { %p176_p8 = por %p175_p7, %p174_p6 }
  0x15   :  { %p177_p9 = pnand %p176_p8, %p170_p5 }
  0x17   :  { %180 = shalt.err (!%p177_p9)
}
  0x18   :  { %s212_s0 = smov 16   ;;  %s213_s21 = smov 1  }
  0x19   :  { %34 = dma.hbm_to_vmem [thread:$0]  %s241_s1, 32, %s29_s19, [#allocation7], %s212_s0, %s212_s0, %s213_s21  }
  0x1a   :  { %201 = dma.done.wait [#allocation4], 64  }
  0x1b   :  { %202 = vsyncadd [#allocation4], 4294967232 }
  0x1c   :  { %203 = dma.done.wait [#allocation7], 32  }
  0x1d   :  { %204 = vsyncadd [#allocation7], 4294967264  ;;  %v214_v0 = vmov 0.0   ;;  %v46_v1 = vld [vmem:[#allocation3] sm:$0x3]  ;;  %vm81_vm2 = vcmask 1041408  }
  0x1e   :  { %45 = vst [vmem:[#allocation2] sm:$0xff] %v214_v0  ;;  %v47_v2 = vld [vmem:[#allocation3 + $0x2] sm:$0x3]  ;;  %v115_v3 = vmul.f32 -1.442695, %v46_v1  ;;  %s215_s1 = smov [#allocation8]  }
  0x1f   :  { %v116_v4 = vmul.f32 -1.442695, %v47_v2  ;;  %v48_v9 = vld [vmem:[#allocation6] sm:$0x1]  ;;  %v49_v10 = vld [vmem:[#allocation6 + $0x1] sm:$0x1] }
  0x20   :  { %126 = vpow2.f32 %v115_v3  ;;  %v50_v11 = vunpack.c.0.s8 %v48_v9  ;;  %v51_v12 = vunpack.c.0.s8 %v49_v10  ;;  %s105_s24 = sshll.u32 %s215_s1, 4  ;;  %s106_s24 = int_to_ptr.vmem [resolvable:$true] %s105_s24 }
  0x21   :  { %128 = vpow2.f32 %v116_v4  ;;  %s181_s25 = scalar_lea.vmem %s106_s24, 128  ;;  %p186_p11 = scmp.lt.s32.totalorder %s106_s24, %s106_s24 }
  0x22   :  { %v52_v13 = vcvt.s32.f32 %v50_v11  ;;  %v53_v14 = vcvt.s32.f32 %v51_v12  ;;  %p182_p10 = scmp.ne.s32.totalorder %s106_s24, %s181_s25  ;;  %p187_p12 = scmp.lt.s32.totalorder %s181_s25, %s181_s25 }
  0x24   :  { %vm66_vm0 = vcmp.ge.f32.partialorder %v52_v13, 0.5  ;;  %vm67_vm1 = vcmp.ge.f32.partialorder %v53_v14, 0.5  ;;  %p188_p13 = por %p187_p12, %p186_p11 }
  0x25   :  { %v80_v38 = vld [vmem:[#allocation2] sm:$0x1] }
  0x26   :  { %p189_p0 = pnand %p188_p13, %p182_p10 }
  0x2d   :  { %v127_v5 = vpop.eup %126 }
  0x2e   :  { %v129_v6 = vpop.eup %128  ;;  %v60_v7 = vadd.f32 1.0, %v127_v5 }
  0x2f   :  { %v61_v8 = vadd.f32 1.0, %v129_v6 }
  0x30   :  { %130 = vrcp.f32 %v60_v7 }
  0x31   :  { %132 = vrcp.f32 %v61_v8 }
  0x3d   :  { %v131_v15 = vpop.eup %130 }
  0x3e   :  { %v133_v16 = vpop.eup %132  ;;  %v68_v17 = vsub.f32 1.0, %v131_v15 }
  0x3f   :  { %v69_v18 = vsub.f32 1.0, %v133_v16 }
  0x40   :  { %v70_v19 = vsel %vm66_vm0, %v131_v15, %v68_v17 }
  0x41   :  { %v71_v20 = vsel %vm67_vm1, %v133_v16, %v69_v18  ;;  %134 = vlog2.f32 %v70_v19 }
  0x42   :  { %136 = vlog2.f32 %v71_v20 }
  0x4e   :  { %v135_v21 = vpop.eup %134 }
  0x4f   :  { %v137_v22 = vpop.eup %136  ;;  %v73_v23 = vmul.f32 0.6931472, %v135_v21 }
  0x50   :  { %v75_v24 = vmul.f32 0.6931472, %v137_v22 }
  0x51   :  { %v76_v25 = vmax.f32 %v73_v23, -100.0 }
  0x52   :  { %v77_v26 = vmax.f32 %v75_v24, -100.0 }
  0x53   :  { %v78_v27 = vsub.f32 0.0, %v76_v25 }
  0x54   :  { %v79_v28 = vsub.f32 0.0, %v77_v26 }
  0x55   :  { %v82_v29 = vsel %vm81_vm2, %v78_v27, 0.0 }
  0x56   :  { %v83_v30 = vsel %vm81_vm2, %v79_v28, 0.0 }
  0x57   :  { %v84_v31 = vadd.f32 %v83_v30, %v82_v29 }
  0x59   :  { %v85_v32 = vsel %vm81_vm2, %v84_v31, 0.0 }
  0x5a   :  { %v86_v33 = vrot.slane %v85_v32, 4 }
  0x5c   :  { %v87_v34 = vadd.f32 %v86_v33, %v85_v32 }
  0x5e   :  { %v88_v35 = vrot.slane %v87_v34, 2 }
  0x60   :  { %v89_v36 = vadd.f32 %v88_v35, %v87_v34 }
  0x62   :  { %v90_v37 = vrot.slane %v89_v36, 1 }
  0x64   :  { %v91_v39 = vadd.f32 %v90_v37, %v89_v36 }
  0x66   :  { %v92_v40 = vadd.f32 %v91_v39, %v80_v38 }
  0x68   :  { %93 = vst [vmem:[#allocation2] sm:$0x1] %v92_v40 }
  0x6f   :  { %v97_v41 = vld [vmem:[#allocation2] sm:$0xff] }
  0x70   :  { %98 = vst [vmem:[#allocation8] sm:$0xff] %v97_v41 }
  0x71   :  { %192 = shalt.err (!%p189_p0)
}
  0x72   :  { %108 = dma.vmem_to_hbm [thread:$0]  %s106_s24, 128, %s242_s2, [#allocation5]  }
  0x73   :  { %205 = dma.done.wait [#allocation5], 128  }
  0x74   :  { %206 = vsyncadd [#allocation5], 4294967168 }
  0x75   :  { %112 = vsyncpa [#allocation4], 1 }
  0x76   :  { %113 = vsyncpa [#allocation7], 1 }
  0x77   :  { %114 = vsyncpa [#allocation5], 1 }

</bundles_post_ra>
